<compile_context>
chip_gen: v5e
topology: v5e:2x2
jax: 0.10.0
libtpu: 0.0.40
codegen_flags: <defaults>
</compile_context>

<pallas_src>
import functools

import jax
import jax.numpy as jnp
from jax.experimental import pallas as pl
from jax.experimental.pallas import tpu as pltpu


def _round_up(x, m):
    return (x + m - 1) // m * m


# ------------------------------ kernels ------------------------------------

def _resnet_block_kernel_identity(x_ref, w0_ref, b0_ref, w1_ref, b1_ref,
                                  out_ref, *, compute_dtype):
    """size_in == size_out:  out = x + fc1(relu(fc0(relu(x))))."""
    x = x_ref[...]
    # relu in the input dtype, then cast (relu commutes with the monotone
    # downcast; avoids a bf16 max on v5e's f32-only VPU).
    xr = jnp.maximum(x, 0).astype(compute_dtype)
    h = jnp.dot(xr, w0_ref[...],
                preferred_element_type=jnp.float32) + b0_ref[...]
    hr = jnp.maximum(h, 0.0).astype(compute_dtype)
    dx = jnp.dot(hr, w1_ref[...],
                 preferred_element_type=jnp.float32) + b1_ref[...]
    out_ref[...] = (x.astype(jnp.float32) + dx).astype(out_ref.dtype)


def _resnet_block_kernel_shortcut(x_ref, w0_ref, b0_ref, w1_ref, b1_ref,
                                  ws_ref, out_ref, *, compute_dtype):
    """size_in != size_out:  out = x @ Ws + fc1(relu(fc0(relu(x))))."""
    x = x_ref[...]
    xr = jnp.maximum(x, 0).astype(compute_dtype)
    h = jnp.dot(xr, w0_ref[...],
                preferred_element_type=jnp.float32) + b0_ref[...]
    hr = jnp.maximum(h, 0.0).astype(compute_dtype)
    # Two accumulating dots instead of a lane-axis concat + single dot: a
    # second MXU push is far cheaper than materialising a (bm, in+h) temp.
    out = jnp.dot(x.astype(compute_dtype), ws_ref[...],
                  preferred_element_type=jnp.float32)
    out = out + jnp.dot(hr, w1_ref[...],
                        preferred_element_type=jnp.float32) + b1_ref[...]
    out_ref[...] = out.astype(out_ref.dtype)


# ------------------------------ wrapper -------------------------------------

def _vmem_capacity_bytes():
    """Generation-aware VMEM capacity (64 MiB v7x, 128 MiB v5e/v6e)."""
    try:
        return int(pltpu.get_tpu_info().vmem_capacity_bytes)
    except Exception:
        return 64 * 1024 * 1024   # conservative (v7x) fallback


def _vmem_bytes_estimate(bm, size_in, size_h, size_out, x_bytes, w_bytes,
                         out_bytes):
    # Double-buffered activation tiles + (conservatively 2x) grid-invariant
    # weights/biases + f32 intermediates.
    acts = 2 * bm * (size_in * x_bytes + size_out * out_bytes)
    weights = 2 * ((size_in * size_h + size_h * size_out
                    + size_in * size_out) * w_bytes
                   + 4 * (size_h + size_out))
    interm = bm * (size_in + 2 * size_h + size_out) * 4
    return acts + weights + interm


def prepare_resnet_block_fc_params(params, compute_dtype=jnp.float32):
    """One-time parameter prep (cast + bias reshape), hoisted out of forward."""
    compute_dtype = jnp.dtype(compute_dtype)
    prepped = {
        "w0": params["w0"].astype(compute_dtype),
        "b0": params["b0"].astype(jnp.float32).reshape(1, -1),
        "w1": params["w1"].astype(compute_dtype),
        "b1": params["b1"].astype(jnp.float32).reshape(1, -1),
    }
    if params.get("ws", None) is not None:
        prepped["ws"] = params["ws"].astype(compute_dtype)
    return prepped


def resnet_block_fc(x, params, *, block_rows=2048, compute_dtype=None,
                    vmem_budget_bytes=None):
    """Pallas ResnetBlockFC forward. x: (N, size_in) -> (N, size_out).

    params: either raw {w0 (in,h), b0 (h,), w1 (h,out), b1 (out,), [ws (in,out)]}
    (weights pre-transposed to (fan_in, fan_out)) or the output of
    `prepare_resnet_block_fc_params` (detected by b0.ndim == 2).
    """
    if params["b0"].ndim != 2:
        params = prepare_resnet_block_fc_params(
            params, x.dtype if compute_dtype is None else compute_dtype)
    compute_dtype = jnp.dtype(params["w0"].dtype)

    w0, b0 = params["w0"], params["b0"]
    w1, b1 = params["w1"], params["b1"]
    ws = params.get("ws", None)

    N, size_in = x.shape
    size_h = w0.shape[1]
    size_out = w1.shape[1]

    # ---- generation-aware VMEM budget / limit ----
    vmem_cap = _vmem_capacity_bytes()
    if vmem_budget_bytes is None:
        vmem_budget_bytes = int(0.6 * vmem_cap)
    vmem_limit_bytes = int(0.7 * vmem_cap)

    # ---- choose the batch tile (big tiles amortize per-step overhead) ----
    x_bytes = jnp.dtype(x.dtype).itemsize
    row_align = {4: 8, 2: 16, 1: 32}.get(x_bytes, 8)
    bm = min(block_rows, N)
    while bm > row_align and _vmem_bytes_estimate(
            bm, size_in, size_h, size_out, x_bytes, compute_dtype.itemsize,
            x_bytes) > vmem_budget_bytes:
        bm = max(row_align, bm // 2)
    if bm < N:
        # when tiling, the row block must be sublane-aligned; the tail tile is
        # handled by Pallas boundary masking (no wrapper-side padding).
        bm = _round_up(bm, row_align)
    grid = (pl.cdiv(N, bm),)

    x_spec = pl.BlockSpec((bm, size_in), lambda i: (i, 0))
    out_spec = pl.BlockSpec((bm, size_out), lambda i: (i, 0))

    def full_spec(shape):
        # grid-invariant operand: whole array as a single block
        return pl.BlockSpec(shape, lambda i: (0, 0))

    in_specs = [x_spec,
                full_spec(w0.shape), full_spec(b0.shape),
                full_spec(w1.shape), full_spec(b1.shape)]
    args = [x, w0, b0, w1, b1]
    if ws is not None:
        in_specs.append(full_spec(ws.shape))
        args.append(ws)
        kernel = functools.partial(_resnet_block_kernel_shortcut,
                                   compute_dtype=compute_dtype)
    else:
        kernel = functools.partial(_resnet_block_kernel_identity,
                                   compute_dtype=compute_dtype)

    return pl.pallas_call(
        kernel,
        out_shape=jax.ShapeDtypeStruct((N, size_out), x.dtype),
        grid=grid,
        in_specs=in_specs,
        out_specs=out_spec,
        compiler_params=pltpu.CompilerParams(
            dimension_semantics=("parallel",),
            vmem_limit_bytes=vmem_limit_bytes),
    )(*args)


# ------------------------- parameter initialization -------------------------

def init_resnet_block_fc(key, size_in, size_out=None, size_h=None,
                         dtype=jnp.float32):
    """Deterministic init mirroring the PyTorch module's __init__."""
    if size_out is None:
        size_out = size_in
    if size_h is None:
        size_h = min(size_in, size_out)

    k0w, k0b, k1b, ksw = jax.random.split(key, 4)

    # nn.Linear default init: U(-1/sqrt(fan_in), 1/sqrt(fan_in))
    bound0 = 1.0 / jnp.sqrt(size_in)
    bound1 = 1.0 / jnp.sqrt(size_h)

    params = {
        "w0": jax.random.uniform(k0w, (size_in, size_h), dtype,
                                 minval=-bound0, maxval=bound0),
        "b0": jax.random.uniform(k0b, (size_h,), dtype,
                                 minval=-bound0, maxval=bound0),
        # nn.init.zeros_(self.fc_1.weight)
        "w1": jnp.zeros((size_h, size_out), dtype),
        "b1": jax.random.uniform(k1b, (size_out,), dtype,
                                 minval=-bound1, maxval=bound1),
    }
    if size_in != size_out:
        params["ws"] = jax.random.uniform(ksw, (size_in, size_out), dtype,
                                          minval=-bound0, maxval=bound0)
    return params


def resnet_block_fc_ref(x, params):
    """Pure-JAX reference for correctness checking."""
    h = jnp.maximum(x, 0.0) @ params["w0"] + params["b0"]
    dx = jnp.maximum(h, 0.0) @ params["w1"] + params["b1"]
    x_s = x @ params["ws"] if "ws" in params else x
    return x_s + dx


# --------------------------------- main --------------------------------------

if __name__ == "__main__":
    key = jax.random.PRNGKey(0)
    kx, kp1, kp2, kw1 = jax.random.split(key, 4)

    N = 200           # not a multiple of 64 -> exercises the masked tail tile
    size_in = 32
    size_out = 64     # != size_in -> exercises the linear (no-bias) shortcut
    # size_h defaults to min(size_in, size_out) = 32

    x = jax.random.normal(kx, (N, size_in), jnp.float32)

    # Case 1: linear shortcut, f32, single big tile. Overwrite the zero-init
    # fc_1 weight with random values so the second matmul is exercised.
    params = init_resnet_block_fc(kp1, size_in, size_out)
    params["w1"] = 0.1 * jax.random.normal(kw1, params["w1"].shape, jnp.float32)
    out = jax.block_until_ready(resnet_block_fc(x, params))
    ref = resnet_block_fc_ref(x, params)
    assert out.shape == (N, size_out)
    assert jnp.allclose(out, ref, atol=1e-4, rtol=1e-4), \
        float(jnp.max(jnp.abs(out - ref)))

    # Case 2: identity shortcut, default zero-init w1, forced small row tile
    # (block_rows=64) -> 4 grid steps with a partially-valid last tile.
    params_id = init_resnet_block_fc(kp2, size_in)
    out_id = jax.block_until_ready(
        resnet_block_fc(x, params_id, block_rows=64))
    ref_id = resnet_block_fc_ref(x, params_id)
    assert out_id.shape == (N, size_in)
    assert jnp.allclose(out_id, ref_id, atol=1e-4, rtol=1e-4), \
        float(jnp.max(jnp.abs(out_id - ref_id)))

    # Case 3: bf16 MXU operands with f32 accumulation, params prepared once
    # (pad/cast hoisted out of the forward). Looser tolerance (bf16 operands
    # also used for the shortcut matmul).
    params_bf16 = prepare_resnet_block_fc_params(params, jnp.bfloat16)
    out_bf = jax.block_until_ready(resnet_block_fc(x, params_bf16))
    assert out_bf.shape == (N, size_out)
    assert jnp.allclose(out_bf, ref, atol=1e-1, rtol=1e-1), \
        float(jnp.max(jnp.abs(out_bf - ref)))

    print("KERNEL_OK")
</pallas_src>

<mosaic_0001>
module attributes {stable_mosaic.version = 11 : i64} {
  func.func @_resnet_block_kernel_shortcut(%arg0: i32, %arg1: memref<200x32xf32, #tpu.memory_space<vmem>>, %arg2: memref<32x32xf32, #tpu.memory_space<vmem>>, %arg3: memref<1x32xf32, #tpu.memory_space<vmem>>, %arg4: memref<32x64xf32, #tpu.memory_space<vmem>>, %arg5: memref<1x64xf32, #tpu.memory_space<vmem>>, %arg6: memref<32x64xf32, #tpu.memory_space<vmem>>, %arg7: memref<200x64xf32, #tpu.memory_space<vmem>>) attributes {dimension_semantics = [#tpu.dimension_semantics<parallel>], iteration_bounds = array<i64: 1>, scalar_prefetch = 0 : i64, scratch_operands = 0 : i64, tpu.core_type = #tpu.core_type<tc>, window_params = [{transform_indices = @transform_0, window_bounds = array<i64: 200, 32>}, {pipeline_mode = #tpu.pipeline_mode<synchronous>, transform_indices = @transform_1, window_bounds = array<i64: 32, 32>}, {pipeline_mode = #tpu.pipeline_mode<synchronous>, transform_indices = @transform_2, window_bounds = array<i64: 1, 32>}, {pipeline_mode = #tpu.pipeline_mode<synchronous>, transform_indices = @transform_3, window_bounds = array<i64: 32, 64>}, {pipeline_mode = #tpu.pipeline_mode<synchronous>, transform_indices = @transform_4, window_bounds = array<i64: 1, 64>}, {pipeline_mode = #tpu.pipeline_mode<synchronous>, transform_indices = @transform_5, window_bounds = array<i64: 32, 64>}, {transform_indices = @transform_6, window_bounds = array<i64: 200, 64>}]} {
    %c0 = arith.constant 0 : index
    %c0_0 = arith.constant 0 : index
    %0 = vector.load %arg1[%c0, %c0_0] : memref<200x32xf32, #tpu.memory_space<vmem>>, vector<200x32xf32>
    %cst = arith.constant 0.000000e+00 : f32
    %1 = vector.broadcast %cst : f32 to vector<200x32xf32>
    %2 = arith.maximumf %0, %1 : vector<200x32xf32>
    %c0_1 = arith.constant 0 : index
    %c0_2 = arith.constant 0 : index
    %3 = vector.load %arg2[%c0_1, %c0_2] : memref<32x32xf32, #tpu.memory_space<vmem>>, vector<32x32xf32>
    %cst_3 = arith.constant dense<0.000000e+00> : vector<200x32xf32>
    %4 = tpu.matmul %2, %3, %cst_3 {dimension_numbers = #tpu.dot_dimension_numbers<[1], [0], [0], [1], [0, 0, 1, 1], [], []>} : vector<200x32xf32>, vector<32x32xf32>, vector<200x32xf32> -> vector<200x32xf32>
    %c0_4 = arith.constant 0 : index
    %c0_5 = arith.constant 0 : index
    %5 = vector.load %arg3[%c0_4, %c0_5] : memref<1x32xf32, #tpu.memory_space<vmem>>, vector<1x32xf32>
    %6 = vector.broadcast %5 : vector<1x32xf32> to vector<200x32xf32>
    %7 = arith.addf %4, %6 : vector<200x32xf32>
    %cst_6 = arith.constant 0.000000e+00 : f32
    %8 = vector.broadcast %cst_6 : f32 to vector<200x32xf32>
    %9 = arith.maximumf %7, %8 : vector<200x32xf32>
    %c0_7 = arith.constant 0 : index
    %c0_8 = arith.constant 0 : index
    %10 = vector.load %arg6[%c0_7, %c0_8] : memref<32x64xf32, #tpu.memory_space<vmem>>, vector<32x64xf32>
    %cst_9 = arith.constant dense<0.000000e+00> : vector<200x64xf32>
    %11 = tpu.matmul %0, %10, %cst_9 {dimension_numbers = #tpu.dot_dimension_numbers<[1], [0], [0], [1], [0, 0, 1, 1], [], []>} : vector<200x32xf32>, vector<32x64xf32>, vector<200x64xf32> -> vector<200x64xf32>
    %c0_10 = arith.constant 0 : index
    %c0_11 = arith.constant 0 : index
    %12 = vector.load %arg4[%c0_10, %c0_11] : memref<32x64xf32, #tpu.memory_space<vmem>>, vector<32x64xf32>
    %cst_12 = arith.constant dense<0.000000e+00> : vector<200x64xf32>
    %13 = tpu.matmul %9, %12, %cst_12 {dimension_numbers = #tpu.dot_dimension_numbers<[1], [0], [0], [1], [0, 0, 1, 1], [], []>} : vector<200x32xf32>, vector<32x64xf32>, vector<200x64xf32> -> vector<200x64xf32>
    %14 = arith.addf %11, %13 : vector<200x64xf32>
    %c0_13 = arith.constant 0 : index
    %c0_14 = arith.constant 0 : index
    %15 = vector.load %arg5[%c0_13, %c0_14] : memref<1x64xf32, #tpu.memory_space<vmem>>, vector<1x64xf32>
    %16 = vector.broadcast %15 : vector<1x64xf32> to vector<200x64xf32>
    %17 = arith.addf %14, %16 : vector<200x64xf32>
    %c0_15 = arith.constant 0 : index
    %c0_16 = arith.constant 0 : index
    %18 = vector.load %arg7[%c0_15, %c0_16] : memref<200x64xf32, #tpu.memory_space<vmem>>, vector<200x64xf32>
    tpu.vector_store %arg7[%c0_15, %c0_16], %17 {strides = array<i32>} : memref<200x64xf32, #tpu.memory_space<vmem>>, vector<200x64xf32>,
    return
  }
  func.func @transform_0(%arg0: i32) -> (i32, i32) {
    %c0_i32 = arith.constant 0 : i32
    %c0_i32_0 = arith.constant 0 : i32
    return %arg0, %c0_i32 : i32, i32
  }
  func.func @transform_1(%arg0: i32) -> (i32, i32) {
    %c0_i32 = arith.constant 0 : i32
    %c0_i32_0 = arith.constant 0 : i32
    %c0_i32_1 = arith.constant 0 : i32
    return %c0_i32, %c0_i32_0 : i32, i32
  }
  func.func @transform_2(%arg0: i32) -> (i32, i32) {
    %c0_i32 = arith.constant 0 : i32
    %c0_i32_0 = arith.constant 0 : i32
    %c0_i32_1 = arith.constant 0 : i32
    return %c0_i32, %c0_i32_0 : i32, i32
  }
  func.func @transform_3(%arg0: i32) -> (i32, i32) {
    %c0_i32 = arith.constant 0 : i32
    %c0_i32_0 = arith.constant 0 : i32
    %c0_i32_1 = arith.constant 0 : i32
    return %c0_i32, %c0_i32_0 : i32, i32
  }
  func.func @transform_4(%arg0: i32) -> (i32, i32) {
    %c0_i32 = arith.constant 0 : i32
    %c0_i32_0 = arith.constant 0 : i32
    %c0_i32_1 = arith.constant 0 : i32
    return %c0_i32, %c0_i32_0 : i32, i32
  }
  func.func @transform_5(%arg0: i32) -> (i32, i32) {
    %c0_i32 = arith.constant 0 : i32
    %c0_i32_0 = arith.constant 0 : i32
    %c0_i32_1 = arith.constant 0 : i32
    return %c0_i32, %c0_i32_0 : i32, i32
  }
  func.func @transform_6(%arg0: i32) -> (i32, i32) {
    %c0_i32 = arith.constant 0 : i32
    %c0_i32_0 = arith.constant 0 : i32
    return %arg0, %c0_i32 : i32, i32
  }
}

</mosaic_0001>

<bundles_post_ra>
// kernel: tpu_custom_call.1
= control target key start
LH: loop header
LB: loop body
LE: loop exit
PB: predicated region body
PF: predicated region fallthrough
CT: control target
= control target key end

     0   :  { %vm81_vm0 = vcmask 261120   ;;  %vm645_vm1 = vcmask 523264   ;;  %s1245_s1 = inlined_call_operand.vmem [shape: f32[32,32], index: 1, kind: input, shape index: {}]   ;;  %s1246_s0 = inlined_call_operand.vmem [shape: f32[200,32], index: 0, kind: input, shape index: {}]   ;;  %s1247_s2 = inlined_call_operand.vmem [shape: f32[1,32], index: 2, kind: input, shape index: {}]   ;;  %s1248_s5 = inlined_call_operand.vmem [shape: f32[32,64], index: 5, kind: input, shape index: {}]   ;;  %s1249_s3 = inlined_call_operand.vmem [shape: f32[32,64], index: 3, kind: input, shape index: {}]   ;;  %s1250_s4 = inlined_call_operand.vmem [shape: f32[1,64], index: 4, kind: input, shape index: {}]   ;;  %s1251_s6 = inlined_call_operand.vmem [shape: f32[200,64], index: 6, kind: output, shape index: {}]  }
   0x1   :  { %v76_v0 = vld [vmem:[%s1245_s1 + $0x18] sm:$0xff]  ;;  %v75_v1 = vld [vmem:[%s1245_s1 + $0x10] sm:$0xff]  ;;  %v808_v2 = vld [vmem:[%s1246_s0] sm:$0xff] }
   0x2   :  { %169 = vmatpush.msra.mxu0 %v76_v0  ;;  %750 = vmatpush.msra.mxu3 %v76_v0  ;;  %v813_v3 = vld [vmem:[%s1246_s0 + $0x98] sm:$0xff]  ;;  %v74_v4 = vld [vmem:[%s1245_s1 + $0x8] sm:$0xff]  ;;  %v73_v5 = vld [vmem:[%s1245_s1] sm:$0xff]  ;;  %v48_v6 = vmax.f32 %v808_v2, 0.0 }
   0x3   :  { %v67_v7 = vmax.f32 %v813_v3, 0.0  ;;  %v828_v8 = vld [vmem:[%s1246_s0 + $0x8] sm:$0xff]  ;;  %v833_v9 = vld [vmem:[%s1246_s0 + $0xa0] sm:$0xff]  ;;  %v842_v12 = vld [vmem:[%s1246_s0 + $0x10] sm:$0xff] }
   0x4   :  { %170 = vmatpush.msra.mxu0 %v75_v1  ;;  %751 = vmatpush.msra.mxu3 %v75_v1  ;;  %v49_v10 = vmax.f32 %v828_v8, 0.0  ;;  %v68_v11 = vmax.f32 %v833_v9, 0.0  ;;  %v847_v13 = vld [vmem:[%s1246_s0 + $0xa8] sm:$0xff]  ;;  %v50_v14 = vmax.f32 %v842_v12, 0.0  ;;  %v856_v16 = vld [vmem:[%s1246_s0 + $0x18] sm:$0xff]  ;;  %v861_v17 = vld [vmem:[%s1246_s0 + $0xb0] sm:$0xff] }
   0x5   :  { %v69_v15 = vmax.f32 %v847_v13, 0.0  ;;  %v51_v18 = vmax.f32 %v856_v16, 0.0  ;;  %v70_v19 = vmax.f32 %v861_v17, 0.0  ;;  %v870_v20 = vld [vmem:[%s1246_s0 + $0x20] sm:$0xff]  ;;  %v875_v21 = vld [vmem:[%s1246_s0 + $0xb8] sm:$0xff]  ;;  %v884_v24 = vld [vmem:[%s1246_s0 + $0x28] sm:$0xff] }
   0x6   :  { %171 = vmatpush.msra.mxu0 %v74_v4  ;;  %752 = vmatpush.msra.mxu3 %v74_v4  ;;  %v52_v22 = vmax.f32 %v870_v20, 0.0  ;;  %v71_v23 = vmax.f32 %v875_v21, 0.0  ;;  %v889_v25 = vld [vmem:[%s1246_s0 + $0xc0] sm:$0xff]  ;;  %v53_v26 = vmax.f32 %v884_v24, 0.0  ;;  %v898_v28 = vld [vmem:[%s1246_s0 + $0x30] sm:$0xff]  ;;  %v905_v30 = vld [vmem:[%s1246_s0 + $0x38] sm:$0xff] }
   0x7   :  { %v72_v27 = vmax.f32 %v889_v25, 0.0  ;;  %v54_v29 = vmax.f32 %v898_v28, 0.0  ;;  %v55_v31 = vmax.f32 %v905_v30, 0.0  ;;  %v912_v32 = vld [vmem:[%s1246_s0 + $0x40] sm:$0xff]  ;;  %v919_v34 = vld [vmem:[%s1246_s0 + $0x48] sm:$0xff]  ;;  %v926_v36 = vld [vmem:[%s1246_s0 + $0x50] sm:$0xff] }
   0x8   :  { %172 = vmatpush.msra.mxu0 %v73_v5  ;;  %753 = vmatpush.msra.mxu3 %v73_v5  ;;  %v56_v33 = vmax.f32 %v912_v32, 0.0  ;;  %v57_v35 = vmax.f32 %v919_v34, 0.0  ;;  %v58_v37 = vmax.f32 %v926_v36, 0.0  ;;  %v277_v38 = vld [vmem:[%s1248_s5 + $0x18] sm:$0xff]  ;;  %v276_v39 = vld [vmem:[%s1248_s5 + $0x10] sm:$0xff]  ;;  %v275_v42 = vld [vmem:[%s1248_s5 + $0x8] sm:$0xff] }
   0x9   :  { %675 = vmatmul.msk.f32.vlgmr.msra.gmra.mxu0 %vm81_vm0, %v48_v6  ;;  %694 = vmatmul.msk.f32.vlgmr.msra.gmra.mxu3 %vm81_vm0, %v67_v7  ;;  %v939_v40 = vld [vmem:[%s1246_s0 + $0x58] sm:$0xff]  ;;  %v274_v44 = vld [vmem:[%s1248_s5] sm:$0xff]  ;;  %v280_v47 = vld [vmem:[%s1249_s3 + $0x10] sm:$0xff] }
   0xa   :  { %536 = vmatpush.msra.mxu2 %v277_v38  ;;  %v59_v41 = vmax.f32 %v939_v40, 0.0  ;;  %v281_v43 = vld [vmem:[%s1249_s3 + $0x18] sm:$0xff]  ;;  %v955_v45 = vld [vmem:[%s1246_s0 + $0x60] sm:$0xff]  ;;  %v279_v48 = vld [vmem:[%s1249_s3 + $0x8] sm:$0xff] }
   0xb   :  { %369 = vmatpush.msra.mxu1 %v281_v43  ;;  %754 = vmatpush.msrb.mxu3 %v281_v43  ;;  %v60_v46 = vmax.f32 %v955_v45, 0.0  ;;  %v278_v49 = vld [vmem:[%s1249_s3] sm:$0xff]  ;;  %v973_v50 = vld [vmem:[%s1246_s0 + $0x68] sm:$0xff]  ;;  %v982_v52 = vld [vmem:[%s1246_s0 + $0x70] sm:$0xff] }
   0xc   :  { %537 = vmatpush.msra.mxu2 %v276_v39  ;;  %v61_v51 = vmax.f32 %v973_v50, 0.0  ;;  %v62_v53 = vmax.f32 %v982_v52, 0.0  ;;  %v991_v54 = vld [vmem:[%s1246_s0 + $0x78] sm:$0xff]  ;;  %v1000_v56 = vld [vmem:[%s1246_s0 + $0x80] sm:$0xff]  ;;  %v1015_v62 = vld [vmem:[%s1246_s0 + $0x88] sm:$0xff] }
   0xd   :  { %370 = vmatpush.msra.mxu1 %v280_v47  ;;  %755 = vmatpush.msrb.mxu3 %v280_v47  ;;  %v63_v55 = vmax.f32 %v991_v54, 0.0  ;;  %v1005_v57 = vld [vmem:[%s1247_s2] ss:$0 sm:$0xff]  ;;  %v64_v58 = vmax.f32 %v1000_v56, 0.0  ;;  %v65_v1 = vmax.f32 %v1015_v62, 0.0  ;;  %v1028_v7 = vld [vmem:[%s1246_s0 + $0x90] sm:$0xff] }
   0xe   :  { %538 = vmatpush.msra.mxu2 %v275_v42 }
   0xf   :  { %371 = vmatpush.msra.mxu1 %v279_v48  ;;  %756 = vmatpush.msrb.mxu3 %v279_v48 }
  0x10   :  { %539 = vmatpush.msra.mxu2 %v274_v44 }
  0x11   :  { %676 = vmatmul.msk.f32.gmra.mxu0 %vm81_vm0, %v49_v10  ;;  %695 = vmatmul.msk.f32.gmra.mxu3 %vm81_vm0, %v68_v11  ;;  %v66_v11 = vmax.f32 %v1028_v7, 0.0 }
  0x12   :  { %725 = vmatmul.msk.f32.vlgmr.msra.gmra.mxu2 %vm81_vm0, %v808_v2  ;;  %372 = vmatpush.msra.mxu1 %v278_v49 }
  0x13   :  { %757 = vmatpush.msrb.mxu3 %v278_v49 }
  0x15   :  { %758 = vmatpush.msra.mxu3 %v277_v38 }
  0x17   :  { %759 = vmatpush.msra.mxu3 %v276_v39 }
  0x19   :  { %677 = vmatmul.msk.f32.gmra.mxu0 %vm81_vm0, %v50_v14  ;;  %696 = vmatmul.msk.f32.gmra.mxu3 %vm81_vm0, %v69_v15 }
  0x1a   :  { %726 = vmatmul.msk.f32.gmra.mxu2 %vm81_vm0, %v828_v8  ;;  %760 = vmatpush.msra.mxu3 %v275_v42 }
  0x1c   :  { %761 = vmatpush.msra.mxu3 %v274_v44 }
  0x21   :  { %678 = vmatmul.msk.f32.gmra.mxu0 %vm81_vm0, %v51_v18  ;;  %697 = vmatmul.msk.f32.gmra.mxu3 %vm81_vm0, %v70_v19 }
  0x22   :  { %727 = vmatmul.msk.f32.gmra.mxu2 %vm81_vm0, %v842_v12 }
  0x29   :  { %679 = vmatmul.msk.f32.gmra.mxu0 %vm81_vm0, %v52_v22  ;;  %698 = vmatmul.msk.f32.gmra.mxu3 %vm81_vm0, %v71_v23 }
  0x2a   :  { %728 = vmatmul.msk.f32.gmra.mxu2 %vm81_vm0, %v856_v16 }
  0x31   :  { %680 = vmatmul.msk.f32.gmra.mxu0 %vm81_vm0, %v53_v26  ;;  %699 = vmatmul.msk.f32.gmra.mxu3 %vm81_vm0, %v72_v27 }
  0x32   :  { %729 = vmatmul.msk.f32.gmra.mxu2 %vm81_vm0, %v870_v20 }
  0x39   :  { %681 = vmatmul.msk.f32.gmra.mxu0 %vm81_vm0, %v54_v29 }
  0x3a   :  { %730 = vmatmul.msk.f32.gmra.mxu2 %vm81_vm0, %v884_v24 }
  0x41   :  { %682 = vmatmul.msk.f32.gmra.mxu0 %vm81_vm0, %v55_v31 }
  0x42   :  { %731 = vmatmul.msk.f32.gmra.mxu2 %vm81_vm0, %v898_v28 }
  0x49   :  { %683 = vmatmul.msk.f32.gmra.mxu0 %vm81_vm0, %v56_v33 }
  0x4a   :  { %732 = vmatmul.msk.f32.gmra.mxu2 %vm81_vm0, %v905_v30 }
  0x51   :  { %684 = vmatmul.msk.f32.gmra.mxu0 %vm81_vm0, %v57_v35 }
  0x52   :  { %733 = vmatmul.msk.f32.gmra.mxu2 %vm81_vm0, %v912_v32 }
  0x59   :  { %685 = vmatmul.msk.f32.gmra.mxu0 %vm81_vm0, %v58_v37 }
  0x5a   :  { %734 = vmatmul.msk.f32.gmra.mxu2 %vm81_vm0, %v919_v34 }
  0x61   :  { %686 = vmatmul.msk.f32.gmra.mxu0 %vm81_vm0, %v59_v41 }
  0x62   :  { %735 = vmatmul.msk.f32.gmra.mxu2 %vm81_vm0, %v926_v36 }
  0x69   :  { %687 = vmatmul.msk.f32.gmra.mxu0 %vm81_vm0, %v60_v46 }
  0x6a   :  { %736 = vmatmul.msk.f32.gmra.mxu2 %vm81_vm0, %v939_v40 }
  0x71   :  { %688 = vmatmul.msk.f32.gmra.mxu0 %vm81_vm0, %v61_v51 }
  0x72   :  { %737 = vmatmul.msk.f32.gmra.mxu2 %vm81_vm0, %v955_v45 }
  0x79   :  { %689 = vmatmul.msk.f32.gmra.mxu0 %vm81_vm0, %v62_v53 }
  0x7a   :  { %738 = vmatmul.msk.f32.gmra.mxu2 %vm81_vm0, %v973_v50 }
  0x81   :  { %690 = vmatmul.msk.f32.gmra.mxu0 %vm81_vm0, %v63_v55 }
  0x82   :  { %739 = vmatmul.msk.f32.gmra.mxu2 %vm81_vm0, %v982_v52 }
  0x86   :  { %v174_v59 = vpop.f32.mrf.mxu0 }
  0x87   :  { %v175_v60 = vadd.f32 %v1005_v57, %v174_v59 }
  0x89   :  { %v249_v61 = vmax.f32 %v175_v60, 0.0  ;;  %691 = vmatmul.msk.f32.gmra.mxu0 %vm81_vm0, %v64_v58 }
  0x8a   :  { %740 = vmatmul.msk.f32.gmra.mxu2 %vm81_vm0, %v991_v54 }
  0x8b   :  { %700 = vmatmul.msk.f32.vlgmr.msra.gmra.mxu1 %vm81_vm0, %v249_v61 }
  0x8c   :  { %v231_v63 = vpop.f32.mrf.mxu3 }
  0x8d   :  { %v232_v0 = vadd.f32 %v1005_v57, %v231_v63 }
  0x8e   :  { %v177_v2 = vpop.f32.mrf.mxu0 }
  0x8f   :  { %v268_v4 = vmax.f32 %v232_v0, 0.0  ;;  %v178_v5 = vadd.f32 %v1005_v57, %v177_v2 }
  0x91   :  { %v250_v6 = vmax.f32 %v178_v5, 0.0  ;;  %692 = vmatmul.msk.f32.gmra.mxu0 %vm81_vm0, %v65_v1  ;;  %719 = vmatmul.msk.f32.vlgmr.msrb.gmra.mxu3 %vm81_vm0, %v268_v4 }
  0x92   :  { %741 = vmatmul.msk.f32.gmra.mxu2 %vm81_vm0, %v1000_v56 }
  0x93   :  { %701 = vmatmul.msk.f32.gmra.mxu1 %vm81_vm0, %v250_v6 }
  0x94   :  { %v234_v8 = vpop.f32.mrf.mxu3 }
  0x95   :  { %v235_v10 = vadd.f32 %v1005_v57, %v234_v8  ;;  %v541_v60 = vpop.f32.mrf.mxu2 }
  0x96   :  { %v180_v12 = vpop.f32.mrf.mxu0 }
  0x97   :  { %v269_v14 = vmax.f32 %v235_v10, 0.0  ;;  %v181_v15 = vadd.f32 %v1005_v57, %v180_v12 }
  0x99   :  { %v251_v16 = vmax.f32 %v181_v15, 0.0  ;;  %693 = vmatmul.msk.f32.gmra.mxu0 %vm81_vm0, %v66_v11  ;;  %720 = vmatmul.msk.f32.gmra.mxu3 %vm81_vm0, %v269_v14 }
  0x9a   :  { %742 = vmatmul.msk.f32.gmra.mxu2 %vm81_vm0, %v1015_v62 }
  0x9b   :  { %702 = vmatmul.msk.f32.gmra.mxu1 %vm81_vm0, %v251_v16 }
  0x9c   :  { %v237_v18 = vpop.f32.mrf.mxu3 }
  0x9d   :  { %v238_v19 = vadd.f32 %v1005_v57, %v237_v18  ;;  %v544_v63 = vpop.f32.mrf.mxu2 }
  0x9e   :  { %v183_v20 = vpop.f32.mrf.mxu0 }
  0x9f   :  { %v270_v22 = vmax.f32 %v238_v19, 0.0  ;;  %v184_v23 = vadd.f32 %v1005_v57, %v183_v20 }
  0xa1   :  { %v252_v24 = vmax.f32 %v184_v23, 0.0  ;;  %721 = vmatmul.msk.f32.gmra.mxu3 %vm81_vm0, %v270_v22 }
  0xa2   :  { %743 = vmatmul.msk.f32.gmra.mxu2 %vm81_vm0, %v1028_v7  ;;  %v1113_v7 = vld [vmem:[%s1250_s4] ss:$0 sm:$0xff] }
  0xa3   :  { %703 = vmatmul.msk.f32.gmra.mxu1 %vm81_vm0, %v252_v24 }
  0xa4   :  { %v240_v26 = vpop.f32.mrf.mxu3 }
  0xa5   :  { %v241_v27 = vadd.f32 %v1005_v57, %v240_v26  ;;  %v547_v2 = vpop.f32.mrf.mxu2 }
  0xa6   :  { %v186_v28 = vpop.f32.mrf.mxu0 }
  0xa7   :  { %v271_v29 = vmax.f32 %v241_v27, 0.0  ;;  %v187_v31 = vadd.f32 %v1005_v57, %v186_v28 }
  0xa9   :  { %v253_v30 = vmax.f32 %v187_v31, 0.0  ;;  %722 = vmatmul.msk.f32.gmra.mxu3 %vm81_vm0, %v271_v29 }
  0xab   :  { %704 = vmatmul.msk.f32.gmra.mxu1 %vm81_vm0, %v253_v30 }
  0xac   :  { %v243_v33 = vpop.f32.mrf.mxu3 }
  0xad   :  { %v244_v35 = vadd.f32 %v1005_v57, %v243_v33  ;;  %v550_v5 = vpop.f32.mrf.mxu2 }
  0xae   :  { %v189_v37 = vpop.f32.mrf.mxu0 }
  0xaf   :  { %v272_v38 = vmax.f32 %v244_v35, 0.0  ;;  %v190_v39 = vadd.f32 %v1005_v57, %v189_v37 }
  0xb1   :  { %v254_v32 = vmax.f32 %v190_v39, 0.0  ;;  %723 = vmatmul.msk.f32.gmra.mxu3 %vm81_vm0, %v272_v38 }
  0xb3   :  { %705 = vmatmul.msk.f32.gmra.mxu1 %vm81_vm0, %v254_v32 }
  0xb4   :  { %v246_v41 = vpop.f32.mrf.mxu3 }
  0xb5   :  { %v247_v42 = vadd.f32 %v1005_v57, %v246_v41  ;;  %v553_v15 = vpop.f32.mrf.mxu2 }
  0xb6   :  { %v192_v43 = vpop.f32.mrf.mxu0 }
  0xb7   :  { %v273_v44 = vmax.f32 %v247_v42, 0.0  ;;  %v193_v46 = vadd.f32 %v1005_v57, %v192_v43 }
  0xb9   :  { %v255_v34 = vmax.f32 %v193_v46, 0.0  ;;  %724 = vmatmul.msk.f32.gmra.mxu3 %vm81_vm0, %v273_v44 }
  0xbb   :  { %706 = vmatmul.msk.f32.gmra.mxu1 %vm81_vm0, %v255_v34 }
  0xbd   :  { %v556_v27 = vpop.f32.mrf.mxu2 }
  0xbe   :  { %v195_v47 = vpop.f32.mrf.mxu0 }
  0xbf   :  { %v196_v48 = vadd.f32 %v1005_v57, %v195_v47 }
  0xc1   :  { %v256_v49 = vmax.f32 %v196_v48, 0.0  ;;  %744 = vmatmul.msk.f32.vlgmr.msra.gmra.mxu3 %vm81_vm0, %v813_v3 }
  0xc3   :  { %707 = vmatmul.msk.f32.gmra.mxu1 %vm81_vm0, %v256_v49 }
  0xc5   :  { %v559_v38 = vpop.f32.mrf.mxu2 }
  0xc6   :  { %v198_v36 = vpop.f32.mrf.mxu0 }
  0xc7   :  { %v199_v51 = vadd.f32 %v1005_v57, %v198_v36 }
  0xc9   :  { %v257_v53 = vmax.f32 %v199_v51, 0.0  ;;  %745 = vmatmul.msk.f32.gmra.mxu3 %vm81_vm0, %v833_v9 }
  0xcb   :  { %708 = vmatmul.msk.f32.gmra.mxu1 %vm81_vm0, %v257_v53 }
  0xcd   :  { %v562_v43 = vpop.f32.mrf.mxu2 }
  0xce   :  { %v201_v40 = vpop.f32.mrf.mxu0 }
  0xcf   :  { %v202_v3 = vadd.f32 %v1005_v57, %v201_v40 }
  0xd1   :  { %v258_v55 = vmax.f32 %v202_v3, 0.0  ;;  %746 = vmatmul.msk.f32.gmra.mxu3 %vm81_vm0, %v847_v13 }
  0xd3   :  { %709 = vmatmul.msk.f32.gmra.mxu1 %vm81_vm0, %v258_v55 }
  0xd5   :  { %v565_v49 = vpop.f32.mrf.mxu2 }
  0xd6   :  { %v204_v45 = vpop.f32.mrf.mxu0 }
  0xd7   :  { %v205_v9 = vadd.f32 %v1005_v57, %v204_v45 }
  0xd9   :  { %v259_v58 = vmax.f32 %v205_v9, 0.0  ;;  %747 = vmatmul.msk.f32.gmra.mxu3 %vm81_vm0, %v861_v17 }
  0xdb   :  { %710 = vmatmul.msk.f32.gmra.mxu1 %vm81_vm0, %v259_v58 }
  0xdd   :  { %v568_v45 = vpop.f32.mrf.mxu2 }
  0xde   :  { %v207_v50 = vpop.f32.mrf.mxu0 }
  0xdf   :  { %v208_v13 = vadd.f32 %v1005_v57, %v207_v50 }
  0xe1   :  { %v260_v59 = vmax.f32 %v208_v13, 0.0  ;;  %748 = vmatmul.msk.f32.gmra.mxu3 %vm81_vm0, %v875_v21 }
  0xe3   :  { %711 = vmatmul.msk.f32.gmra.mxu1 %vm81_vm0, %v260_v59 }
  0xe6   :  { %v210_v52 = vpop.f32.mrf.mxu0 }
  0xe7   :  { %v211_v17 = vadd.f32 %v1005_v57, %v210_v52  ;;  %v571_v52 = vpop.f32.mrf.mxu2 }
  0xe9   :  { %v261_v61 = vmax.f32 %v211_v17, 0.0  ;;  %749 = vmatmul.msk.f32.gmra.mxu3 %vm81_vm0, %v889_v25 }
  0xeb   :  { %712 = vmatmul.msk.f32.gmra.mxu1 %vm81_vm0, %v261_v61 }
  0xee   :  { %v213_v54 = vpop.f32.mrf.mxu0 }
  0xef   :  { %v214_v21 = vadd.f32 %v1005_v57, %v213_v54 }
  0xf1   :  { %v262_v0 = vmax.f32 %v214_v21, 0.0 }
  0xf3   :  { %713 = vmatmul.msk.f32.gmra.mxu1 %vm81_vm0, %v262_v0 }
  0xf6   :  { %v216_v56 = vpop.f32.mrf.mxu0 }
  0xf7   :  { %v217_v1 = vadd.f32 %v1005_v57, %v216_v56 }
  0xf9   :  { %v263_v25 = vmax.f32 %v217_v1, 0.0  ;;  %v574_v1 = vpop.f32.mrf.mxu2 }
  0xfb   :  { %714 = vmatmul.msk.f32.gmra.mxu1 %vm81_vm0, %v263_v25 }
  0xfe   :  { %v219_v4 = vpop.f32.mrf.mxu0 }
  0xff   :  { %v220_v62 = vadd.f32 %v1005_v57, %v219_v4 }
 0x101   :  { %v264_v6 = vmax.f32 %v220_v62, 0.0 }
 0x103   :  { %715 = vmatmul.msk.f32.gmra.mxu1 %vm81_vm0, %v264_v6 }
 0x106   :  { %v222_v8 = vpop.f32.mrf.mxu0 }
 0x107   :  { %v223_v10 = vadd.f32 %v1005_v57, %v222_v8 }
 0x108   :  { %v374_v11 = vpop.f32.mrf.mxu1 }
 0x109   :  { %v265_v12 = vmax.f32 %v223_v10, 0.0  ;;  %v542_v14 = vadd.f32 %v541_v60, %v374_v11  ;;  %v577_v10 = vpop.f32.mrf.mxu2 }
 0x10b   :  { %v620_v16 = vadd.f32 %v1113_v7, %v542_v14  ;;  %716 = vmatmul.msk.f32.gmra.mxu1 %vm81_vm0, %v265_v12 }
 0x10d   :  { %646 = vst.msk [vmem:[%s1251_s6] sm:$0xff] %vm645_vm1, %v620_v16 }
 0x10e   :  { %v225_v18 = vpop.f32.mrf.mxu0 }
 0x10f   :  { %v226_v19 = vadd.f32 %v1005_v57, %v225_v18 }
 0x110   :  { %v377_v20 = vpop.f32.mrf.mxu1 }
 0x111   :  { %v266_v22 = vmax.f32 %v226_v19, 0.0  ;;  %v545_v23 = vadd.f32 %v544_v63, %v377_v20 }
 0x113   :  { %v621_v24 = vadd.f32 %v1113_v7, %v545_v23  ;;  %717 = vmatmul.msk.f32.gmra.mxu1 %vm81_vm0, %v266_v22  ;;  %v580_v22 = vpop.f32.mrf.mxu2 }
 0x114   :  { %v431_v26 = vpop.f32.mrf.mxu3 }
 0x115   :  { %647 = vst.msk [vmem:[%s1251_s6 + $0x8] sm:$0xff] %vm645_vm1, %v621_v24 }
 0x116   :  { %v228_v28 = vpop.f32.mrf.mxu0 }
 0x117   :  { %v229_v29 = vadd.f32 %v1005_v57, %v228_v28 }
 0x118   :  { %v380_v31 = vpop.f32.mrf.mxu1 }
 0x119   :  { %v267_v30 = vmax.f32 %v229_v29, 0.0  ;;  %v548_v33 = vadd.f32 %v547_v2, %v380_v31 }
 0x11b   :  { %v622_v35 = vadd.f32 %v1113_v7, %v548_v33  ;;  %718 = vmatmul.msk.f32.gmra.mxu1 %vm81_vm0, %v267_v30  ;;  %v583_v30 = vpop.f32.mrf.mxu2 }
 0x11c   :  { %v434_v37 = vpop.f32.mrf.mxu3 }
 0x11d   :  { %648 = vst.msk [vmem:[%s1251_s6 + $0x10] sm:$0xff] %vm645_vm1, %v622_v35 }
 0x120   :  { %v383_v39 = vpop.f32.mrf.mxu1 }
 0x121   :  { %v551_v32 = vadd.f32 %v550_v5, %v383_v39 }
 0x123   :  { %v623_v41 = vadd.f32 %v1113_v7, %v551_v32  ;;  %v586_v32 = vpop.f32.mrf.mxu2 }
 0x124   :  { %v437_v42 = vpop.f32.mrf.mxu3 }
 0x125   :  { %649 = vst.msk [vmem:[%s1251_s6 + $0x18] sm:$0xff] %vm645_vm1, %v623_v41 }
 0x128   :  { %v386_v57 = vpop.f32.mrf.mxu1 }
 0x129   :  { %v554_v44 = vadd.f32 %v553_v15, %v386_v57 }
 0x12b   :  { %v624_v46 = vadd.f32 %v1113_v7, %v554_v44  ;;  %v589_v44 = vpop.f32.mrf.mxu2 }
 0x12c   :  { %v440_v34 = vpop.f32.mrf.mxu3 }
 0x12d   :  { %650 = vst.msk [vmem:[%s1251_s6 + $0x20] sm:$0xff] %vm645_vm1, %v624_v46 }
 0x130   :  { %v389_v47 = vpop.f32.mrf.mxu1 }
 0x131   :  { %v557_v48 = vadd.f32 %v556_v27, %v389_v47 }
 0x133   :  { %v625_v36 = vadd.f32 %v1113_v7, %v557_v48 }
 0x134   :  { %v443_v51 = vpop.f32.mrf.mxu3 }
 0x135   :  { %651 = vst.msk [vmem:[%s1251_s6 + $0x28] sm:$0xff] %vm645_vm1, %v625_v36 }
 0x138   :  { %v392_v53 = vpop.f32.mrf.mxu1 }
 0x139   :  { %v560_v40 = vadd.f32 %v559_v38, %v392_v53 }
 0x13b   :  { %v626_v3 = vadd.f32 %v1113_v7, %v560_v40 }
 0x13c   :  { %v446_v55 = vpop.f32.mrf.mxu3 }
 0x13d   :  { %652 = vst.msk [vmem:[%s1251_s6 + $0x30] sm:$0xff] %vm645_vm1, %v626_v3 }
 0x140   :  { %v395_v9 = vpop.f32.mrf.mxu1 }
 0x141   :  { %v563_v58 = vadd.f32 %v562_v43, %v395_v9 }
 0x143   :  { %v627_v50 = vadd.f32 %v1113_v7, %v563_v58 }
 0x144   :  { %v598_v13 = vpop.f32.mrf.mxu3 }
 0x145   :  { %653 = vst.msk [vmem:[%s1251_s6 + $0x38] sm:$0xff] %vm645_vm1, %v627_v50  ;;  %v599_v59 = vadd.f32 %v598_v13, %v431_v26 }
 0x147   :  { %v639_v17 = vadd.f32 %v1113_v7, %v599_v59 }
 0x148   :  { %v398_v60 = vpop.f32.mrf.mxu1 }
 0x149   :  { %665 = vst.msk [vmem:[%s1251_s6 + $0x98] sm:$0xff] %vm645_vm1, %v639_v17  ;;  %v566_v61 = vadd.f32 %v565_v49, %v398_v60  ;;  %v592_v49 = vpop.f32.mrf.mxu2 }
 0x14b   :  { %v628_v54 = vadd.f32 %v1113_v7, %v566_v61 }
 0x14c   :  { %v601_v21 = vpop.f32.mrf.mxu3 }
 0x14d   :  { %654 = vst.msk [vmem:[%s1251_s6 + $0x40] sm:$0xff] %vm645_vm1, %v628_v54  ;;  %v602_v63 = vadd.f32 %v601_v21, %v434_v37 }
 0x14f   :  { %v640_v0 = vadd.f32 %v1113_v7, %v602_v63 }
 0x150   :  { %v401_v56 = vpop.f32.mrf.mxu1 }
 0x151   :  { %666 = vst.msk [vmem:[%s1251_s6 + $0xa0] sm:$0xff] %vm645_vm1, %v640_v0  ;;  %v569_v2 = vadd.f32 %v568_v45, %v401_v56  ;;  %v595_v40 = vpop.f32.mrf.mxu2 }
 0x153   :  { %v629_v25 = vadd.f32 %v1113_v7, %v569_v2 }
 0x154   :  { %v604_v4 = vpop.f32.mrf.mxu3 }
 0x155   :  { %655 = vst.msk [vmem:[%s1251_s6 + $0x48] sm:$0xff] %vm645_vm1, %v629_v25  ;;  %v605_v62 = vadd.f32 %v604_v4, %v437_v42 }
 0x157   :  { %v641_v5 = vadd.f32 %v1113_v7, %v605_v62 }
 0x158   :  { %v404_v6 = vpop.f32.mrf.mxu1 }
 0x159   :  { %667 = vst.msk [vmem:[%s1251_s6 + $0xa8] sm:$0xff] %vm645_vm1, %v641_v5  ;;  %v572_v8 = vadd.f32 %v571_v52, %v404_v6 }
 0x15b   :  { %v630_v11 = vadd.f32 %v1113_v7, %v572_v8 }
 0x15c   :  { %v607_v12 = vpop.f32.mrf.mxu3 }
 0x15d   :  { %656 = vst.msk [vmem:[%s1251_s6 + $0x50] sm:$0xff] %vm645_vm1, %v630_v11  ;;  %v608_v14 = vadd.f32 %v607_v12, %v440_v34 }
 0x15f   :  { %v642_v15 = vadd.f32 %v1113_v7, %v608_v14 }
 0x160   :  { %v407_v16 = vpop.f32.mrf.mxu1 }
 0x161   :  { %668 = vst.msk [vmem:[%s1251_s6 + $0xb0] sm:$0xff] %vm645_vm1, %v642_v15  ;;  %v575_v18 = vadd.f32 %v574_v1, %v407_v16 }
 0x163   :  { %v631_v19 = vadd.f32 %v1113_v7, %v575_v18 }
 0x164   :  { %v610_v20 = vpop.f32.mrf.mxu3 }
 0x165   :  { %657 = vst.msk [vmem:[%s1251_s6 + $0x58] sm:$0xff] %vm645_vm1, %v631_v19  ;;  %v611_v23 = vadd.f32 %v610_v20, %v443_v51 }
 0x167   :  { %v643_v24 = vadd.f32 %v1113_v7, %v611_v23 }
 0x168   :  { %v410_v26 = vpop.f32.mrf.mxu1 }
 0x169   :  { %669 = vst.msk [vmem:[%s1251_s6 + $0xb8] sm:$0xff] %vm645_vm1, %v643_v24  ;;  %v578_v27 = vadd.f32 %v577_v10, %v410_v26 }
 0x16b   :  { %v632_v28 = vadd.f32 %v1113_v7, %v578_v27 }
 0x16c   :  { %v613_v29 = vpop.f32.mrf.mxu3 }
 0x16d   :  { %658 = vst.msk [vmem:[%s1251_s6 + $0x60] sm:$0xff] %vm645_vm1, %v632_v28  ;;  %v614_v31 = vadd.f32 %v613_v29, %v446_v55 }
 0x16f   :  { %v644_v33 = vadd.f32 %v1113_v7, %v614_v31 }
 0x170   :  { %v413_v35 = vpop.f32.mrf.mxu1 }
 0x171   :  { %670 = vst.msk [vmem:[%s1251_s6 + $0xc0] sm:$0xff] %vm645_vm1, %v644_v33  ;;  %v581_v37 = vadd.f32 %v580_v22, %v413_v35 }
 0x173   :  { %v633_v38 = vadd.f32 %v1113_v7, %v581_v37 }
 0x175   :  { %659 = vst.msk [vmem:[%s1251_s6 + $0x68] sm:$0xff] %vm645_vm1, %v633_v38 }
 0x178   :  { %v416_v39 = vpop.f32.mrf.mxu1 }
 0x179   :  { %v584_v41 = vadd.f32 %v583_v30, %v416_v39 }
 0x17b   :  { %v634_v42 = vadd.f32 %v1113_v7, %v584_v41 }
 0x17d   :  { %660 = vst.msk [vmem:[%s1251_s6 + $0x70] sm:$0xff] %vm645_vm1, %v634_v42 }
 0x180   :  { %v419_v57 = vpop.f32.mrf.mxu1 }
 0x181   :  { %v587_v43 = vadd.f32 %v586_v32, %v419_v57 }
 0x183   :  { %v635_v46 = vadd.f32 %v1113_v7, %v587_v43 }
 0x185   :  { %661 = vst.msk [vmem:[%s1251_s6 + $0x78] sm:$0xff] %vm645_vm1, %v635_v46 }
 0x188   :  { %v422_v34 = vpop.f32.mrf.mxu1 }
 0x189   :  { %v590_v47 = vadd.f32 %v589_v44, %v422_v34 }
 0x18b   :  { %v636_v48 = vadd.f32 %v1113_v7, %v590_v47 }
 0x18d   :  { %662 = vst.msk [vmem:[%s1251_s6 + $0x80] sm:$0xff] %vm645_vm1, %v636_v48 }
 0x190   :  { %v425_v36 = vpop.f32.mrf.mxu1 }
 0x191   :  { %v593_v51 = vadd.f32 %v592_v49, %v425_v36 }
 0x193   :  { %v637_v53 = vadd.f32 %v1113_v7, %v593_v51 }
 0x195   :  { %663 = vst.msk [vmem:[%s1251_s6 + $0x88] sm:$0xff] %vm645_vm1, %v637_v53 }
 0x198   :  { %v428_v3 = vpop.f32.mrf.mxu1 }
 0x199   :  { %v596_v55 = vadd.f32 %v595_v40, %v428_v3 }
 0x19b   :  { %v638_v45 = vadd.f32 %v1113_v7, %v596_v55 }
 0x19d   :  { %664 = vst.msk [vmem:[%s1251_s6 + $0x90] sm:$0xff] %vm645_vm1, %v638_v45 }

</bundles_post_ra>
